<compile_context>
chip_gen: v7x
topology: tpu7x:2x2x1
jax: 0.10.0
libtpu: 0.0.40
codegen_flags: <defaults>
</compile_context>

<pallas_src>
import functools
import math

import jax
import jax.numpy as jnp
from jax.experimental import pallas as pl
from jax.experimental.pallas import tpu as pltpu


_MIN_BLOCK_BYTES = 1 * 1024 * 1024   # never shrink a block below this just to add grid steps


@functools.lru_cache(maxsize=None)
def _tpu_memory_params():
    """Generation-aware sizing: (vmem_limit_bytes, target_block_bytes, single_pass_limit).

    v5e/v6e have 128 MiB VMEM/core (2 MiB blocks already sit at ~85-90% of their HBM
    roofline); v7x has only 64 MiB VMEM but ~2.3x the HBM bandwidth, so it wants
    larger blocks but a lower single-pass cutoff (the fused path double-buffers
    in + out => ~4x the per-sample slab must fit inside the scoped limit).
    """
    vmem_cap = 64 * 1024 * 1024                       # conservative default (v7x-sized)
    try:
        cap = getattr(pltpu.get_tpu_info(), "vmem_capacity_bytes", None)
        if cap:
            vmem_cap = int(cap)
    except Exception:
        pass
    if vmem_cap >= 100 * 1024 * 1024:                 # v5e / v6e (128 MiB physical)
        vmem_limit = 64 * 1024 * 1024
        target_block = 2 * 1024 * 1024
        single_pass_limit = 14 * 1024 * 1024          # 4 x 14 = 56 MiB < 64 MiB limit
    else:                                             # v7x (64 MiB physical)
        vmem_limit = 44 * 1024 * 1024
        target_block = 4 * 1024 * 1024
        single_pass_limit = 10 * 1024 * 1024          # 4 x 10 = 40 MiB < 44 MiB limit
    return vmem_limit, target_block, single_pass_limit


# ----------------------------- single-pass fused kernel -----------------------------


def _twa_fused_kernel(x_ref, w1_ref, w2_ref, o_ref):
    """x_ref/o_ref: (BN, T, F); w1: (T//r, T); w2: (T, T//r)."""
    x = x_ref[...]
    # Global average pool over the feature dim, f32 accumulation (no full-tile upcast).
    aa = jnp.mean(x, axis=-1, dtype=jnp.float32)                          # (BN, T)
    # Shared MLP as real batched matmuls: relu(aa @ W1.T) @ W2.T, f32 accumulate.
    h = jnp.maximum(
        jax.lax.dot_general(aa, w1_ref[...], (((1,), (1,)), ((), ())),
                            preferred_element_type=jnp.float32), 0.0)     # (BN, T//r)
    scores = jax.nn.sigmoid(
        jax.lax.dot_general(h, w2_ref[...], (((1,), (1,)), ((), ())),
                            preferred_element_type=jnp.float32))          # (BN, T)
    # Scale in f32 (scores stay f32 like the torch reference); single cast on store.
    o_ref[...] = (x.astype(jnp.float32) * scores[:, :, None]).astype(o_ref.dtype)


# ----------------------------- two-phase (large-F) fallback -------------------------


def _twa_mean_mlp_kernel(x_ref, w1_ref, w2_ref, scores_ref, acc_ref, *,
                         f_total, needs_mask):
    """Phase 1: accumulate per-(n, t) sums over F tiles, run the tiny MLP at the end.

    x_ref: (1, T, TF) tile; scores_ref: (1, 1, T) per-sample block; acc_ref: (1, T) f32.
    """
    fi = pl.program_id(1)
    nf = pl.num_programs(1)
    t = x_ref.shape[1]
    tf = x_ref.shape[2]

    @pl.when(fi == 0)
    def _():
        acc_ref[...] = jnp.zeros_like(acc_ref)

    if needs_mask:
        # Only the last (ragged) F tile needs lane masking; keep the hot loop lean.
        @pl.when(fi < nf - 1)
        def _():
            acc_ref[...] += jnp.sum(x_ref[...], axis=-1, dtype=jnp.float32)

        @pl.when(fi == nf - 1)
        def _():
            col = jax.lax.broadcasted_iota(jnp.int32, (1, t, tf), 2)
            valid = (fi * tf + col) < f_total
            xw = jnp.where(valid, x_ref[...], 0)
            acc_ref[...] += jnp.sum(xw, axis=-1, dtype=jnp.float32)
    else:
        acc_ref[...] += jnp.sum(x_ref[...], axis=-1, dtype=jnp.float32)

    @pl.when(fi == nf - 1)
    def _():
        aa = acc_ref[...] * (1.0 / f_total)                               # (1, T)
        h = jnp.maximum(
            jax.lax.dot_general(aa, w1_ref[...], (((1,), (1,)), ((), ())),
                                preferred_element_type=jnp.float32), 0.0)
        s = jax.nn.sigmoid(
            jax.lax.dot_general(h, w2_ref[...], (((1,), (1,)), ((), ())),
                                preferred_element_type=jnp.float32))      # (1, T)
        scores_ref[...] = s[:, None, :]                                   # (1, 1, T)


def _twa_scale_kernel(scores_ref, x_ref, o_ref):
    """Phase 2: o = x * scores broadcast over F. scores: (1, 1, T); x/o: (1, T, TF)."""
    s = scores_ref[...]                                                   # (1, 1, T) f32
    x = x_ref[...]
    o_ref[...] = (x.astype(jnp.float32) * s[:, 0, :, None]).astype(o_ref.dtype)


# ----------------------------------- block sizing -----------------------------------


def _choose_bn(n, per_sample_bytes, target_block_bytes):
    bn = max(1, target_block_bytes // max(1, per_sample_bytes))
    bn = min(bn, n)
    # Keep enough grid steps for pipelining / megacore (>= 4 steps = 2 per v7x core
    # when n allows, >= 2 otherwise), but never shrink a block below ~1 MiB just to
    # add steps (small blocks fall off the HBM roofline).
    min_bn = max(1, _MIN_BLOCK_BYTES // max(1, per_sample_bytes))
    if n >= 4:
        bn = min(bn, max(min_bn, n // 4))
    elif n >= 2:
        bn = min(bn, max(min_bn, (n + 1) // 2))
    bn = min(bn, n)
    # cdiv-balanced split instead of forcing bn | n.  A ragged last block is safe:
    # the MLP never mixes rows, so padded rows only produce garbage scores for rows
    # that Pallas masks out of the writeback.
    bn = pl.cdiv(n, pl.cdiv(n, bn))
    return int(max(1, bn))


def _choose_tf(f, t, itemsize, target_block_bytes):
    tf = target_block_bytes // max(1, t * itemsize)
    tf = max(128, (tf // 128) * 128)          # lane-dense: multiple of 128 -> unmasked stores
    tf = min(tf, ((f + 127) // 128) * 128)
    return int(tf)


# ----------------------------------- wrappers ----------------------------------------


def _single_pass(x_r, w1, w2, n, t, f, per_sample_bytes, vmem_limit, target_block):
    bn = _choose_bn(n, per_sample_bytes, target_block)
    return pl.pallas_call(
        _twa_fused_kernel,
        out_shape=jax.ShapeDtypeStruct((n, t, f), x_r.dtype),
        grid=(pl.cdiv(n, bn),),
        in_specs=[
            pl.BlockSpec((bn, t, f), lambda i: (i, 0, 0)),
            pl.BlockSpec(w1.shape, lambda i: (0, 0)),
            pl.BlockSpec(w2.shape, lambda i: (0, 0)),
        ],
        out_specs=pl.BlockSpec((bn, t, f), lambda i: (i, 0, 0)),
        compiler_params=pltpu.CompilerParams(
            dimension_semantics=("parallel",),
            vmem_limit_bytes=vmem_limit,
        ),
    )(x_r, w1, w2)


def _two_phase(x_r, w1, w2, n, t, f, vmem_limit, target_block):
    itemsize = jnp.dtype(x_r.dtype).itemsize
    tf = _choose_tf(f, t, itemsize, target_block)
    nf = pl.cdiv(f, tf)
    needs_mask = (f % tf) != 0
    grid = (n, nf)

    scores = pl.pallas_call(
        functools.partial(_twa_mean_mlp_kernel, f_total=f, needs_mask=needs_mask),
        out_shape=jax.ShapeDtypeStruct((n, 1, t), jnp.float32),
        grid=grid,
        in_specs=[
            pl.BlockSpec((1, t, tf), lambda i, j: (i, 0, j)),
            pl.BlockSpec(w1.shape, lambda i, j: (0, 0)),
            pl.BlockSpec(w2.shape, lambda i, j: (0, 0)),
        ],
        out_specs=pl.BlockSpec((1, 1, t), lambda i, j: (i, 0, 0)),
        scratch_shapes=[pltpu.VMEM((1, t), jnp.float32)],
        compiler_params=pltpu.CompilerParams(
            dimension_semantics=("parallel", "arbitrary"),
            vmem_limit_bytes=vmem_limit,
        ),
    )(x_r, w1, w2)

    return pl.pallas_call(
        _twa_scale_kernel,
        out_shape=jax.ShapeDtypeStruct((n, t, f), x_r.dtype),
        grid=grid,
        in_specs=[
            pl.BlockSpec((1, 1, t), lambda i, j: (i, 0, 0)),
            pl.BlockSpec((1, t, tf), lambda i, j: (i, 0, j)),
        ],
        out_specs=pl.BlockSpec((1, t, tf), lambda i, j: (i, 0, j)),
        compiler_params=pltpu.CompilerParams(
            dimension_semantics=("parallel", "parallel"),
            vmem_limit_bytes=vmem_limit,
        ),
    )(scores, x_r)


@functools.partial(jax.jit, static_argnames=("t", "single_pass_block_limit"))
def temporal_wise_attention(x, w1, w2, *, t, single_pass_block_limit=None):
    """x: [B, *feature_dims] with B = N * t (time is the inner factor of the flat
    batch dim, exactly matching the torch module's `.view(B // T, T)`);
    w1: [t//r, t]; w2: [t, t//r].  Works for dimension = 2 / 3 / 4 alike since the
    torch forward only avg-pools over all feature dims."""
    B = x.shape[0]
    assert B % t == 0, "batch dim must be N * T"
    n = B // t
    f = math.prod(x.shape[1:])
    itemsize = jnp.dtype(x.dtype).itemsize
    x_r = x.reshape(n, t, f)

    vmem_limit, target_block, auto_cutoff = _tpu_memory_params()
    cutoff = auto_cutoff if single_pass_block_limit is None else single_pass_block_limit

    per_sample_bytes = t * f * itemsize
    if per_sample_bytes <= cutoff:
        out = _single_pass(x_r, w1, w2, n, t, f, per_sample_bytes, vmem_limit, target_block)
    else:
        # Very large feature maps: reduce pass + scale pass (one extra read of x,
        # but every block stays inside the scoped-VMEM budget and DMAs stay large).
        out = _two_phase(x_r, w1, w2, n, t, f, vmem_limit, target_block)
    return out.reshape(x.shape)


def _reference(x, w1, w2, t):
    """Pure-JAX re-implementation of the PyTorch forward."""
    B = x.shape[0]
    N = B // t
    aa = jnp.mean(x.reshape(B, -1), axis=-1).reshape(N, t)
    h = jnp.maximum(aa @ w1.T, 0.0)
    scores = jax.nn.sigmoid(h @ w2.T).reshape(B, *([1] * (x.ndim - 1)))
    return x * scores


if __name__ == "__main__":
    T = 8          # time steps
    reduction = 2
    N = 2          # number of sequences
    C, H, W = 4, 16, 16
    B = N * T

    key = jax.random.PRNGKey(0)
    kx, k1, k2 = jax.random.split(key, 3)

    x = jax.random.normal(kx, (B, C, H, W), dtype=jnp.float32)
    # PyTorch Linear weight layout: [out_features, in_features].
    w1 = jax.random.normal(k1, (T // reduction, T), dtype=jnp.float32) * (1.0 / jnp.sqrt(T))
    w2 = jax.random.normal(k2, (T, T // reduction), dtype=jnp.float32) * (
        1.0 / jnp.sqrt(T // reduction))

    # Single-pass fused path.
    y = jax.block_until_ready(temporal_wise_attention(x, w1, w2, t=T))
    y_ref = _reference(x, w1, w2, T)
    assert y.shape == x.shape
    assert jnp.allclose(y, y_ref, atol=1e-5, rtol=1e-5), "single-pass mismatch"

    # Force the two-phase (large-F) fallback on the same data to exercise that path.
    y2 = jax.block_until_ready(
        temporal_wise_attention(x, w1, w2, t=T, single_pass_block_limit=0))
    assert jnp.allclose(y2, y_ref, atol=1e-5, rtol=1e-5), "two-phase mismatch"

    # Feature count that is not a multiple of 128 and an odd N (exercises ragged
    # feature tiles + the cdiv-balanced BN choice).
    x3 = jax.random.normal(kx, (3 * T, 3, 10, 10), dtype=jnp.float32)
    y3 = jax.block_until_ready(temporal_wise_attention(x3, w1, w2, t=T))
    y3f = jax.block_until_ready(
        temporal_wise_attention(x3, w1, w2, t=T, single_pass_block_limit=0))
    y3_ref = _reference(x3, w1, w2, T)
    assert jnp.allclose(y3, y3_ref, atol=1e-5, rtol=1e-5), "ragged single-pass mismatch"
    assert jnp.allclose(y3f, y3_ref, atol=1e-5, rtol=1e-5), "ragged two-phase mismatch"

    print("KERNEL_OK")
</pallas_src>

<mosaic_0001>
module attributes {stable_mosaic.version = 11 : i64} {
  func.func @_twa_fused_kernel(%arg0: i32, %arg1: memref<2x8x1024xf32, #tpu.memory_space<vmem>>, %arg2: memref<4x8xf32, #tpu.memory_space<vmem>>, %arg3: memref<8x4xf32, #tpu.memory_space<vmem>>, %arg4: memref<2x8x1024xf32, #tpu.memory_space<vmem>>) attributes {dimension_semantics = [#tpu.dimension_semantics<parallel>], iteration_bounds = array<i64: 1>, scalar_prefetch = 0 : i64, scratch_operands = 0 : i64, tpu.core_type = #tpu.core_type<tc>, window_params = [{transform_indices = @transform_0, window_bounds = array<i64: 2, 8, 1024>}, {pipeline_mode = #tpu.pipeline_mode<synchronous>, transform_indices = @transform_1, window_bounds = array<i64: 4, 8>}, {pipeline_mode = #tpu.pipeline_mode<synchronous>, transform_indices = @transform_2, window_bounds = array<i64: 8, 4>}, {transform_indices = @transform_3, window_bounds = array<i64: 2, 8, 1024>}]} {
    %c0 = arith.constant 0 : index
    %c0_0 = arith.constant 0 : index
    %c0_1 = arith.constant 0 : index
    %0 = vector.load %arg1[%c0, %c0_0, %c0_1] : memref<2x8x1024xf32, #tpu.memory_space<vmem>>, vector<2x8x1024xf32>
    %cst = arith.constant dense<0.000000e+00> : vector<2x8xf32>
    %1 = vector.multi_reduction <add>, %0, %cst [2] : vector<2x8x1024xf32> to vector<2x8xf32>
    %cst_2 = arith.constant 1.024000e+03 : f32
    %2 = vector.broadcast %cst_2 : f32 to vector<2x8xf32>
    %3 = arith.divf %1, %2 : vector<2x8xf32>
    %c0_3 = arith.constant 0 : index
    %c0_4 = arith.constant 0 : index
    %4 = vector.load %arg2[%c0_3, %c0_4] : memref<4x8xf32, #tpu.memory_space<vmem>>, vector<4x8xf32>
    %cst_5 = arith.constant dense<0.000000e+00> : vector<2x4xf32>
    %5 = tpu.matmul %3, %4, %cst_5 {dimension_numbers = #tpu.dot_dimension_numbers<[1], [1], [0], [0], [0, 0, 1, 0], [], []>} : vector<2x8xf32>, vector<4x8xf32>, vector<2x4xf32> -> vector<2x4xf32>
    %cst_6 = arith.constant 0.000000e+00 : f32
    %6 = vector.broadcast %cst_6 : f32 to vector<2x4xf32>
    %7 = arith.maximumf %5, %6 : vector<2x4xf32>
    %c0_7 = arith.constant 0 : index
    %c0_8 = arith.constant 0 : index
    %8 = vector.load %arg3[%c0_7, %c0_8] : memref<8x4xf32, #tpu.memory_space<vmem>>, vector<8x4xf32>
    %cst_9 = arith.constant dense<0.000000e+00> : vector<2x8xf32>
    %9 = tpu.matmul %7, %8, %cst_9 {dimension_numbers = #tpu.dot_dimension_numbers<[1], [1], [0], [0], [0, 0, 1, 0], [], []>} : vector<2x4xf32>, vector<8x4xf32>, vector<2x8xf32> -> vector<2x8xf32>
    %10 = arith.negf %9 : vector<2x8xf32>
    %11 = math.exp %10 : vector<2x8xf32>
    %cst_10 = arith.constant 1.000000e+00 : f32
    %12 = vector.broadcast %cst_10 : f32 to vector<2x8xf32>
    %13 = arith.addf %12, %11 : vector<2x8xf32>
    %14 = arith.divf %12, %13 : vector<2x8xf32>
    %15 = vector.shape_cast %14 : vector<2x8xf32> to vector<2x8x1xf32>
    %16 = vector.broadcast %15 : vector<2x8x1xf32> to vector<2x8x1024xf32>
    %17 = arith.mulf %0, %16 : vector<2x8x1024xf32>
    %c0_11 = arith.constant 0 : index
    %c0_12 = arith.constant 0 : index
    %c0_13 = arith.constant 0 : index
    %18 = vector.load %arg4[%c0_11, %c0_12, %c0_13] : memref<2x8x1024xf32, #tpu.memory_space<vmem>>, vector<2x8x1024xf32>
    tpu.vector_store %arg4[%c0_11, %c0_12, %c0_13], %17 {strides = array<i32>} : memref<2x8x1024xf32, #tpu.memory_space<vmem>>, vector<2x8x1024xf32>,
    return
  }
  func.func @transform_0(%arg0: i32) -> (i32, i32, i32) {
    %c0_i32 = arith.constant 0 : i32
    %c0_i32_0 = arith.constant 0 : i32
    %c0_i32_1 = arith.constant 0 : i32
    return %arg0, %c0_i32, %c0_i32_0 : i32, i32, i32
  }
  func.func @transform_1(%arg0: i32) -> (i32, i32) {
    %c0_i32 = arith.constant 0 : i32
    %c0_i32_0 = arith.constant 0 : i32
    %c0_i32_1 = arith.constant 0 : i32
    return %c0_i32, %c0_i32_0 : i32, i32
  }
  func.func @transform_2(%arg0: i32) -> (i32, i32) {
    %c0_i32 = arith.constant 0 : i32
    %c0_i32_0 = arith.constant 0 : i32
    %c0_i32_1 = arith.constant 0 : i32
    return %c0_i32, %c0_i32_0 : i32, i32
  }
  func.func @transform_3(%arg0: i32) -> (i32, i32, i32) {
    %c0_i32 = arith.constant 0 : i32
    %c0_i32_0 = arith.constant 0 : i32
    %c0_i32_1 = arith.constant 0 : i32
    return %arg0, %c0_i32, %c0_i32_0 : i32, i32, i32
  }
}

</mosaic_0001>

<bundles_post_ra>
// kernel: temporal_wise_attention.1
= control target key start
LH: loop header
LB: loop body
LE: loop exit
PB: predicated region body
PF: predicated region fallthrough
CT: control target
= control target key end

     0   :  { %v302_v30 = vmov 0.0   ;;  %vm66_vm0 = vcmask 64512   ;;  %vm303_vm1 = vmmov 0   ;;  %v54_v32 = vlaneseq  ;;  %s492_s0 = inlined_call_operand.vmem [shape: f32[2,8,1024], index: 0, kind: input, shape index: {}]   ;;  %s493_s1 = inlined_call_operand.vmem [shape: f32[4,8], index: 1, kind: input, shape index: {}]   ;;  %s494_s2 = inlined_call_operand.vmem [shape: f32[8,4], index: 2, kind: input, shape index: {}]   ;;  %s495_s3 = inlined_call_operand.vmem [shape: f32[2,8,1024], index: 3, kind: output, shape index: {}]  }
   0x1   :  { %v327_v0 = vld [vmem:[%s492_s0] sm:$0xff]  ;;  %v332_v1 = vld [vmem:[%s492_s0 + $0x8] sm:$0xff]  ;;  %v337_v2 = vld [vmem:[%s492_s0 + $0x10] sm:$0xff]  ;;  %286 = vmatprep.subr.mxu0 %v302_v30  ;;  %291 = vmatprep.subr.mxu1 %v302_v30  ;;  %vm64_vm2 = vcmask 1041409   ;;  %vm144_vm3 = vcmask 31744  }
   0x2   :  { %v30_v3 = vadd.f32 %v332_v1, %v327_v0  ;;  %v344_v4 = vld [vmem:[%s492_s0 + $0x18] sm:$0xff]  ;;  %v349_v5 = vld [vmem:[%s492_s0 + $0x40] sm:$0xff]  ;;  %v355_v7 = vld [vmem:[%s492_s0 + $0x48] sm:$0xff]  ;;  %288 = vmatprep.mubr.msk.f32.mxu0 %vm303_vm1, %v302_v30  ;;  %293 = vmatprep.mubr.msk.f32.mxu1 %vm303_vm1, %v302_v30  ;;  %v55_v33 = vand.u32 127, %v54_v32  ;;  %v57_v34 = vshrl.u32 %v54_v32, 7 }
   0x3   :  { %v360_v8 = vld [vmem:[%s492_s0 + $0x50] sm:$0xff]  ;;  %v365_v9 = vld [vmem:[%s492_s0 + $0x20] sm:$0xff]  ;;  %v39_v10 = vadd.f32 %v355_v7, %v349_v5  ;;  %v373_v12 = vld [vmem:[%s492_s0 + $0x58] sm:$0xff] }
   0x4   :  { %v31_v6 = vadd.f32 %v30_v3, %v337_v2  ;;  %v378_v13 = vld [vmem:[%s492_s0 + $0x28] sm:$0xff]  ;;  %v385_v16 = vld [vmem:[%s492_s0 + $0x60] sm:$0xff]  ;;  %v390_v17 = vld [vmem:[%s492_s0 + $0x30] sm:$0xff]  ;;  %v58_v36 = vsub.s32 %v55_v33, %v57_v34  ;;  %v229_v52 = vsub.s32 0, %v57_v34  ;;  %v236_v55 = vsub.s32 1, %v57_v34 }
   0x5   :  { %v40_v14 = vadd.f32 %v39_v10, %v360_v8  ;;  %v397_v20 = vld [vmem:[%s492_s0 + $0x68] sm:$0xff]  ;;  %v402_v21 = vld [vmem:[%s492_s0 + $0x38] sm:$0xff]  ;;  %v409_v24 = vld [vmem:[%s492_s0 + $0x70] sm:$0xff] }
   0x6   :  { %v32_v11 = vadd.f32 %v31_v6, %v344_v4  ;;  %v416_v27 = vld [vmem:[%s492_s0 + $0x78] sm:$0xff]  ;;  %v51_v31 = vld [vmem:[%s493_s1] sm:$0xf] }
   0x7   :  { %v41_v18 = vadd.f32 %v40_v14, %v373_v12  ;;  %287 = vmatpush3.xpose.msk.msra.mxu0 %vm66_vm0, %v51_v31  ;;  %v143_v43 = vld [vmem:[%s494_s2] sm:$0xff] }
   0x8   :  { %v33_v15 = vadd.f32 %v32_v11, %v365_v9  ;;  %292 = vmatpush3.xpose.msk.msra.mxu1 %vm144_vm3, %v143_v43 }
   0x9   :  { %v42_v22 = vadd.f32 %v41_v18, %v385_v16 }
   0xa   :  { %v34_v19 = vadd.f32 %v33_v15, %v378_v13 }
   0xb   :  { %v43_v25 = vadd.f32 %v42_v22, %v397_v20 }
   0xc   :  { %v35_v23 = vadd.f32 %v34_v19, %v390_v17 }
   0xd   :  { %v44_v28 = vadd.f32 %v43_v25, %v409_v24 }
   0xe   :  { %v36_v26 = vadd.f32 %v35_v23, %v402_v21 }
   0xf   :  { %v45_v29 = vadd.f32 %v44_v28, %v416_v27 }
  0x10   :  { %37 = vadd.xlane.f32.xlu0 %v36_v26 }
  0x14   :  { %46 = vadd.xlane.f32.xlu0 %v45_v29 }
  0x9d   :  { %v38_v35 = vpop.xlane.xlu0 %37 }
  0x9e   :  { %v49_v37 = vmul.f32 0.0009765625, %v38_v35 }
  0xa0   :  { %v59_v40 = vrot.slane %v49_v37, %v58_v36 }
  0xa1   :  { %v47_v38 = vpop.xlane.xlu0 %46 }
  0xa2   :  { %v50_v39 = vmul.f32 0.0009765625, %v47_v38 }
  0xa4   :  { %v63_v41 = vrot.slane %v50_v39, %v58_v36 }
  0xa6   :  { %v65_v42 = vsel %vm64_vm2, %v63_v41, %v59_v40 }
  0xa7   :  { %289 = vmatmul.mubr.msk.f32.vlgmr.msra.gmra.mrb[0].mxu0 %vm66_vm0, %v65_v42 }
 0x17a   :  { %v138_v44 = vpop.f32.mrb[0].mxu0 }
 0x17b   :  { %v142_v45 = vmax.f32 %v138_v44, 0.0  ;;  %v290_v46 = vpop.f32.mrb[1].mxu0 }
 0x17d   :  { %294 = vmatmul.mubr.msk.f32.vlgmr.msra.gmra.mrb[0].mxu1 %vm144_vm3, %v142_v45 }
 0x250   :  { %v217_v47 = vpop.f32.mrb[0].mxu1 }
 0x251   :  { %v281_v48 = vmul.f32 -1.442695, %v217_v47  ;;  %v295_v49 = vpop.f32.mrb[1].mxu1 }
 0x253   :  { %298 = vpow2.f32 %v281_v48 }
 0x25d   :  { %v299_v50 = vpop.eup %298 }
 0x25e   :  { %v224_v51 = vadd.f32 1.0, %v299_v50 }
 0x260   :  { %300 = vrcp.f32 %v224_v51 }
 0x26a   :  { %v301_v53 = vpop.eup %300 }
 0x26b   :  { %v230_v54 = vrot.slane %v301_v53, %v229_v52  ;;  %v237_v56 = vrot.slane %v301_v53, %v236_v55 }
 0x26d   :  { %232 = vbcast.lane.b32.xlu1 %v230_v54, 256 }
 0x271   :  { %239 = vbcast.lane.b32.xlu1 %v237_v56, 256 }
 0x2df   :  { %v233_v57 = vpop.permute.xlu1 %232 }
 0x2e0   :  { %v241_v58 = vmul.f32 %v233_v57, %v327_v0  ;;  %v242_v59 = vmul.f32 %v233_v57, %v332_v1  ;;  %v243_v60 = vmul.f32 %v233_v57, %v337_v2  ;;  %v244_v61 = vmul.f32 %v233_v57, %v344_v4 }
 0x2e1   :  { %v245_v62 = vmul.f32 %v233_v57, %v365_v9  ;;  %v246_v63 = vmul.f32 %v233_v57, %v378_v13  ;;  %v247_v3 = vmul.f32 %v233_v57, %v390_v17  ;;  %v248_v6 = vmul.f32 %v233_v57, %v402_v21 }
 0x2e2   :  { %257 = vst [vmem:[%s495_s3] sm:$0xff] %v241_v58  ;;  %258 = vst [vmem:[%s495_s3 + $0x8] sm:$0xff] %v242_v59 }
 0x2e3   :  { %259 = vst [vmem:[%s495_s3 + $0x10] sm:$0xff] %v243_v60  ;;  %260 = vst [vmem:[%s495_s3 + $0x18] sm:$0xff] %v244_v61  ;;  %v240_v0 = vpop.permute.xlu1 %239 }
 0x2e4   :  { %261 = vst [vmem:[%s495_s3 + $0x20] sm:$0xff] %v245_v62  ;;  %262 = vst [vmem:[%s495_s3 + $0x28] sm:$0xff] %v246_v63  ;;  %v249_v1 = vmul.f32 %v240_v0, %v349_v5  ;;  %v250_v2 = vmul.f32 %v240_v0, %v355_v7  ;;  %v251_v4 = vmul.f32 %v240_v0, %v360_v8 }
 0x2e5   :  { %263 = vst [vmem:[%s495_s3 + $0x30] sm:$0xff] %v247_v3  ;;  %264 = vst [vmem:[%s495_s3 + $0x38] sm:$0xff] %v248_v6  ;;  %v252_v9 = vmul.f32 %v240_v0, %v373_v12  ;;  %v253_v10 = vmul.f32 %v240_v0, %v385_v16  ;;  %v254_v11 = vmul.f32 %v240_v0, %v397_v20 }
 0x2e6   :  { %v255_v13 = vmul.f32 %v240_v0, %v409_v24  ;;  %v256_v14 = vmul.f32 %v240_v0, %v416_v27  ;;  %265 = vst [vmem:[%s495_s3 + $0x40] sm:$0xff] %v249_v1  ;;  %266 = vst [vmem:[%s495_s3 + $0x48] sm:$0xff] %v250_v2 }
 0x2e7   :  { %267 = vst [vmem:[%s495_s3 + $0x50] sm:$0xff] %v251_v4  ;;  %268 = vst [vmem:[%s495_s3 + $0x58] sm:$0xff] %v252_v9 }
 0x2e8   :  { %269 = vst [vmem:[%s495_s3 + $0x60] sm:$0xff] %v253_v10  ;;  %270 = vst [vmem:[%s495_s3 + $0x68] sm:$0xff] %v254_v11 }
 0x2e9   :  { %271 = vst [vmem:[%s495_s3 + $0x70] sm:$0xff] %v255_v13  ;;  %272 = vst [vmem:[%s495_s3 + $0x78] sm:$0xff] %v256_v14 }

</bundles_post_ra>
